<compile_context>
chip_gen: v7x
topology: tpu7x:2x2x1
jax: 0.10.0
libtpu: 0.0.40
codegen_flags: <defaults>
</compile_context>

<pallas_src>
import jax
import jax.numpy as jnp
from jax.experimental import pallas as pl
from jax.experimental.pallas import tpu as pltpu


def _decoder_kernel(user_ref, pos_ref, neg_ref, out_ref):
    # Upcast to f32 before the multiply/reduce (no bf16 VPU on v5e; keeps
    # accuracy everywhere), cast back on the single packed store.
    u = user_ref[...].astype(jnp.float32)
    p = pos_ref[...].astype(jnp.float32)
    n = neg_ref[...].astype(jnp.float32)

    pos = jnp.sum(u * p, axis=1, keepdims=True)  # (TB, 1) f32
    neg = jnp.sum(u * n, axis=1, keepdims=True)  # (TB, 1) f32

    # One store of the whole (TB, 2) output block.
    out_ref[...] = jnp.concatenate([pos, neg], axis=1).astype(out_ref.dtype)


def _vmem_capacity_bytes():
    """Physical VMEM of the local TPU generation, with a safe fallback."""
    try:
        info = pltpu.get_tpu_info()
        cap = int(getattr(info, "vmem_capacity_bytes", 0) or 0)
        if cap > 0:
            return cap
    except Exception:
        pass
    # Conservative fallback: v7x per-TensorCore VMEM (smallest generation).
    return 64 * 1024 * 1024


def decoder_forward(user_rep, pos_item_rep, neg_item_rep, *, block_rows=None):
    """Pallas equivalent of Decoder.forward.

    Inputs: (B, D) arrays (f32 or bf16). Returns (pos_scores, neg_scores),
    each of shape (B,) in the input dtype.
    """
    B, D = user_rep.shape
    assert pos_item_rep.shape == (B, D) and neg_item_rep.shape == (B, D)
    dtype = user_rep.dtype
    itemsize = jnp.dtype(dtype).itemsize

    # Layout-aware sizes.
    sub = max(8, 32 // itemsize)                    # native sublane multiple
    padded_d = ((D + 127) // 128) * 128             # lane padding of a row
    bytes_per_row_in = padded_d * itemsize          # one padded input row
    bytes_per_row_out = 128 * itemsize              # (TB,2) block pads to 128 lanes

    # Working-set denominator per tile row:
    #   3 inputs x 2 pipeline buffers + 1 output x 2 pipeline buffers.
    denom = 6 * bytes_per_row_in + 2 * bytes_per_row_out

    # Generation-aware VMEM budget (~62.5% of physical: ~40 MiB on v7x,
    # ~80 MiB on v5e/v6e), leaving headroom for internal scratch.
    physical_vmem = _vmem_capacity_bytes()
    budget_bytes = (physical_vmem * 5) // 8

    if block_rows is None:
        tb = budget_bytes // denom
        tb = max(sub, (tb // sub) * sub)
    else:
        tb = int(block_rows)

    if tb >= B:
        # A single block fits. If B is large enough, still split into >=2
        # tiles so the "parallel" axis can shard across v7x's two
        # TensorCores (each tile must keep >= ~1 MiB of input traffic or
        # >= 512 rows to amortize the ~0.35 us per-grid-step overhead).
        min_split_rows = max(512, (1 << 20) // max(1, 3 * bytes_per_row_in))
        if block_rows is None and B >= 2 * min_split_rows:
            ntiles = 4 if B >= 4 * min_split_rows else 2
            tb = -(-B // ntiles)              # ceil(B / ntiles)
            tb = -(-tb // sub) * sub          # round UP to sublane multiple
            if tb >= B:
                tb = B                        # rounding collapsed the split
        else:
            tb = B                            # full array == valid block shape
    else:
        # Tiled path: sublane dim must be a multiple of the native sublane count.
        tb = max(sub, (tb // sub) * sub)

    grid = (pl.cdiv(B, tb),)

    # Explicit scoped-VMEM limit sized from the real (padded) working set.
    working_set = 6 * tb * bytes_per_row_in + 2 * tb * bytes_per_row_out
    vmem_limit = int(
        min(max(working_set + (4 << 20), 16 << 20), (physical_vmem * 9) // 10)
    )

    in_spec = pl.BlockSpec((tb, D), lambda i: (i, 0))
    out_spec = pl.BlockSpec((tb, 2), lambda i: (i, 0))

    cost = pl.CostEstimate(
        flops=4 * B * D,  # 2 muls + 2 adds per element (pos + neg)
        transcendentals=0,
        bytes_accessed=3 * B * D * itemsize + 2 * B * itemsize,
    )

    scores = pl.pallas_call(
        _decoder_kernel,
        out_shape=jax.ShapeDtypeStruct((B, 2), dtype),
        grid=grid,
        in_specs=[in_spec, in_spec, in_spec],
        out_specs=out_spec,
        compiler_params=pltpu.CompilerParams(
            dimension_semantics=("parallel",),   # shard batch tiles across TCs (v7x)
            vmem_limit_bytes=vmem_limit,
        ),
        cost_estimate=cost,
    )(user_rep, pos_item_rep, neg_item_rep)

    return scores[:, 0], scores[:, 1]


if __name__ == "__main__":
    key = jax.random.PRNGKey(0)
    k1, k2, k3 = jax.random.split(key, 3)

    # --- Case 1: tiny shapes consistent with the module (single block). ---
    B, D = 8, 32
    u = jax.random.normal(k1, (B, D), dtype=jnp.float32)
    p = jax.random.normal(k2, (B, D), dtype=jnp.float32)
    n = jax.random.normal(k3, (B, D), dtype=jnp.float32)

    pos, neg = decoder_forward(u, p, n)
    jax.block_until_ready((pos, neg))
    assert pos.shape == (B,) and neg.shape == (B,)
    assert jnp.allclose(pos, jnp.sum(u * p, axis=1), atol=1e-5, rtol=1e-5)
    assert jnp.allclose(neg, jnp.sum(u * n, axis=1), atol=1e-5, rtol=1e-5)

    # --- Case 2: multi-block pipelined grid with a ragged final tile. ---
    B2, D2 = 200, 128
    u2 = jax.random.normal(k1, (B2, D2), dtype=jnp.float32)
    p2 = jax.random.normal(k2, (B2, D2), dtype=jnp.float32)
    n2 = jax.random.normal(k3, (B2, D2), dtype=jnp.float32)

    pos2, neg2 = decoder_forward(u2, p2, n2, block_rows=64)
    jax.block_until_ready((pos2, neg2))
    assert jnp.allclose(pos2, jnp.sum(u2 * p2, axis=1), atol=1e-4, rtol=1e-4)
    assert jnp.allclose(neg2, jnp.sum(u2 * n2, axis=1), atol=1e-4, rtol=1e-4)

    # --- Case 3: bf16 inputs (bandwidth path), f32 accumulation in-kernel. ---
    u3 = u2.astype(jnp.bfloat16)
    p3 = p2.astype(jnp.bfloat16)
    n3 = n2.astype(jnp.bfloat16)

    pos3, neg3 = decoder_forward(u3, p3, n3)
    jax.block_until_ready((pos3, neg3))
    ref_p3 = jnp.sum(u3.astype(jnp.float32) * p3.astype(jnp.float32), axis=1)
    ref_n3 = jnp.sum(u3.astype(jnp.float32) * n3.astype(jnp.float32), axis=1)
    assert jnp.allclose(pos3.astype(jnp.float32), ref_p3, atol=5e-2, rtol=5e-2)
    assert jnp.allclose(neg3.astype(jnp.float32), ref_n3, atol=5e-2, rtol=5e-2)

    print("KERNEL_OK")
</pallas_src>

<mosaic_0001>
module attributes {stable_mosaic.version = 11 : i64} {
  func.func @_decoder_kernel(%arg0: i32, %arg1: memref<8x32xf32, #tpu.memory_space<vmem>>, %arg2: memref<8x32xf32, #tpu.memory_space<vmem>>, %arg3: memref<8x32xf32, #tpu.memory_space<vmem>>, %arg4: memref<8x2xf32, #tpu.memory_space<vmem>>) attributes {dimension_semantics = [#tpu.dimension_semantics<parallel>], iteration_bounds = array<i64: 1>, scalar_prefetch = 0 : i64, scratch_operands = 0 : i64, tpu.core_type = #tpu.core_type<tc>, window_params = [{transform_indices = @transform_0, window_bounds = array<i64: 8, 32>}, {transform_indices = @transform_1, window_bounds = array<i64: 8, 32>}, {transform_indices = @transform_2, window_bounds = array<i64: 8, 32>}, {transform_indices = @transform_3, window_bounds = array<i64: 8, 2>}]} {
    %c0 = arith.constant 0 : index
    %c0_0 = arith.constant 0 : index
    %0 = vector.load %arg1[%c0, %c0_0] : memref<8x32xf32, #tpu.memory_space<vmem>>, vector<8x32xf32>
    %c0_1 = arith.constant 0 : index
    %c0_2 = arith.constant 0 : index
    %1 = vector.load %arg2[%c0_1, %c0_2] : memref<8x32xf32, #tpu.memory_space<vmem>>, vector<8x32xf32>
    %c0_3 = arith.constant 0 : index
    %c0_4 = arith.constant 0 : index
    %2 = vector.load %arg3[%c0_3, %c0_4] : memref<8x32xf32, #tpu.memory_space<vmem>>, vector<8x32xf32>
    %3 = arith.mulf %0, %1 : vector<8x32xf32>
    %cst = arith.constant dense<0.000000e+00> : vector<8xf32>
    %4 = vector.multi_reduction <add>, %3, %cst [1] : vector<8x32xf32> to vector<8xf32>
    %5 = vector.shape_cast %4 : vector<8xf32> to vector<8x1xf32>
    %6 = arith.mulf %0, %2 : vector<8x32xf32>
    %cst_5 = arith.constant dense<0.000000e+00> : vector<8xf32>
    %7 = vector.multi_reduction <add>, %6, %cst_5 [1] : vector<8x32xf32> to vector<8xf32>
    %8 = vector.shape_cast %7 : vector<8xf32> to vector<8x1xf32>
    %9 = tpu.concatenate %5, %8 in 1 : vector<8x1xf32>, vector<8x1xf32> -> vector<8x2xf32>
    %c0_6 = arith.constant 0 : index
    %c0_7 = arith.constant 0 : index
    %10 = vector.load %arg4[%c0_6, %c0_7] : memref<8x2xf32, #tpu.memory_space<vmem>>, vector<8x2xf32>
    tpu.vector_store %arg4[%c0_6, %c0_7], %9 {strides = array<i32>} : memref<8x2xf32, #tpu.memory_space<vmem>>, vector<8x2xf32>,
    return
  }
  func.func @transform_0(%arg0: i32) -> (i32, i32) {
    %c0_i32 = arith.constant 0 : i32
    %c0_i32_0 = arith.constant 0 : i32
    return %arg0, %c0_i32 : i32, i32
  }
  func.func @transform_1(%arg0: i32) -> (i32, i32) {
    %c0_i32 = arith.constant 0 : i32
    %c0_i32_0 = arith.constant 0 : i32
    return %arg0, %c0_i32 : i32, i32
  }
  func.func @transform_2(%arg0: i32) -> (i32, i32) {
    %c0_i32 = arith.constant 0 : i32
    %c0_i32_0 = arith.constant 0 : i32
    return %arg0, %c0_i32 : i32, i32
  }
  func.func @transform_3(%arg0: i32) -> (i32, i32) {
    %c0_i32 = arith.constant 0 : i32
    %c0_i32_0 = arith.constant 0 : i32
    return %arg0, %c0_i32 : i32, i32
  }
}

</mosaic_0001>

<bundles_post_ra>
// kernel: tpu_custom_call.1
= control target key start
LH: loop header
LB: loop body
LE: loop exit
PB: predicated region body
PF: predicated region fallthrough
CT: control target
= control target key end

     0   :  { %8 = vsyncpa [#allocation3], 0  ;;  %s206_s0 = inlined_call_operand.hbm [shape: f32[8,32], index: 0, kind: input, shape index: {}]   ;;  %s207_s1 = inlined_call_operand.hbm [shape: f32[8,32], index: 1, kind: input, shape index: {}]   ;;  %s208_s2 = inlined_call_operand.hbm [shape: f32[8,32], index: 2, kind: input, shape index: {}]   ;;  %s209_s3 = inlined_call_operand.vmem [shape: f32[8,2], index: 3, kind: output, shape index: {}]  }
   0x1   :  { %9 = vsyncpa [#allocation5], 0  ;;  %s144_s12 = smov [#allocation4]   ;;  %s145_s14 = smov [#allocation2]  }
   0x2   :  { %s26_s13 = sshll.u32 %s144_s12, 4  ;;  %s16_s15 = sshll.u32 %s145_s14, 4  ;;  %s27_s13 = int_to_ptr.vmem [resolvable:$true] %s26_s13  ;;  %s17_s15 = int_to_ptr.vmem [resolvable:$true] %s16_s15 }
   0x3   :  { %s74_s18 = scalar_lea.hbm %s207_s1, 128 }
   0x4   :  { %p75_p0 = scmp.ne.s32.totalorder %s207_s1, %s74_s18  ;;  %p78_p1 = scmp.lt.u32.totalorder %s74_s18, %s207_s1 }
   0x6   :  { %p80_p2 = pnand %p78_p1, %p75_p0 }
   0x8   :  { %83 = shalt.err (!%p80_p2)
}
   0x9   :  { %s84_s23 = scalar_lea.vmem %s27_s13, 128  ;;  %p89_p4 = scmp.lt.s32.totalorder %s27_s13, %s27_s13 }
   0xa   :  { %p85_p3 = scmp.ne.s32.totalorder %s27_s13, %s84_s23  ;;  %p90_p5 = scmp.lt.s32.totalorder %s84_s23, %s84_s23 }
   0xc   :  { %p91_p6 = por %p90_p5, %p89_p4 }
   0xe   :  { %p92_p7 = pnand %p91_p6, %p85_p3 }
  0x10   :  { %95 = shalt.err (!%p92_p7)
}
  0x11   :  { %29 = dma.hbm_to_vmem [thread:$0]  %s207_s1, 128, %s27_s13, [#allocation5]  }
  0x12   :  { %s96_s28 = scalar_lea.hbm %s206_s0, 128 }
  0x13   :  { %p97_p8 = scmp.ne.s32.totalorder %s206_s0, %s96_s28  ;;  %p100_p9 = scmp.lt.u32.totalorder %s96_s28, %s206_s0 }
  0x15   :  { %p102_p10 = pnand %p100_p9, %p97_p8 }
  0x17   :  { %105 = shalt.err (!%p102_p10)
}
  0x18   :  { %s106_s6 = scalar_lea.vmem %s17_s15, 128  ;;  %p111_p12 = scmp.lt.s32.totalorder %s17_s15, %s17_s15 }
  0x19   :  { %p107_p11 = scmp.ne.s32.totalorder %s17_s15, %s106_s6  ;;  %p112_p13 = scmp.lt.s32.totalorder %s106_s6, %s106_s6 }
  0x1b   :  { %p113_p0 = por %p112_p13, %p111_p12 }
  0x1d   :  { %p114_p1 = pnand %p113_p0, %p107_p11 }
  0x1f   :  { %117 = shalt.err (!%p114_p1)
}
  0x20   :  { %19 = dma.hbm_to_vmem [thread:$0]  %s206_s0, 128, %s17_s15, [#allocation3]  }
  0x21   :  { %s146_s8 = smov [#allocation6]   ;;  %s118_s12 = scalar_lea.hbm %s208_s2, 128 }
  0x22   :  { %s36_s9 = sshll.u32 %s146_s8, 4  ;;  %p119_p2 = scmp.ne.s32.totalorder %s208_s2, %s118_s12  ;;  %s37_s9 = int_to_ptr.vmem [resolvable:$true] %s36_s9 }
  0x23   :  { %p122_p3 = scmp.lt.u32.totalorder %s118_s12, %s208_s2 }
  0x25   :  { %p124_p4 = pnand %p122_p3, %p119_p2 }
  0x27   :  { %127 = shalt.err (!%p124_p4)
}
  0x28   :  { %s128_s18 = scalar_lea.vmem %s37_s9, 128  ;;  %p133_p6 = scmp.lt.s32.totalorder %s37_s9, %s37_s9 }
  0x29   :  { %p129_p5 = scmp.ne.s32.totalorder %s37_s9, %s128_s18  ;;  %p134_p7 = scmp.lt.s32.totalorder %s128_s18, %s128_s18 }
  0x2b   :  { %p135_p8 = por %p134_p7, %p133_p6 }
  0x2d   :  { %p136_p9 = pnand %p135_p8, %p129_p5 }
  0x2f   :  { %139 = shalt.err (!%p136_p9)
}
  0x30   :  { %39 = dma.hbm_to_vmem [thread:$0]  %s208_s2, 128, %s37_s9, [#allocation5]  }
  0x31   :  { %140 = dma.done.wait [#allocation3], 128  }
  0x32   :  { %141 = vsyncadd [#allocation3], 4294967168 }
  0x33   :  { %142 = dma.done.wait [#allocation5], 256  }
  0x34   :  { %143 = vsyncadd [#allocation5], 4294967040  ;;  %v49_v0 = vld [vmem:[#allocation2] sm:$0xff]  ;;  %v50_v1 = vld [vmem:[#allocation4] sm:$0xff]  ;;  %vm53_vm0 = vcmask 261120   ;;  %vm61_vm1 = vcmask 7168  }
  0x35   :  { %v51_v2 = vld [vmem:[#allocation6] sm:$0xff]  ;;  %v52_v3 = vmul.f32 %v50_v1, %v49_v0  ;;  %vm63_vm2 = vcmask 15360  }
  0x36   :  { %v57_v4 = vmul.f32 %v51_v2, %v49_v0 }
  0x37   :  { %v54_v5 = vsel %vm53_vm0, %v52_v3, 0.0 }
  0x38   :  { %55 = vadd.xlane.f32.xlu0 %v54_v5  ;;  %v58_v6 = vsel %vm53_vm0, %v57_v4, 0.0 }
  0x3c   :  { %59 = vadd.xlane.f32.xlu0 %v58_v6 }
  0xc5   :  { %v56_v7 = vpop.xlane.xlu0 %55 }
  0xc9   :  { %v60_v8 = vpop.xlane.xlu0 %59 }
  0xca   :  { %v62_v9 = vsel %vm61_vm1, %v56_v7, %v60_v8 }
  0xcb   :  { %64 = vst.msk [vmem:[%s209_s3] sm:$0xff] %vm63_vm2, %v62_v9 }
  0xcc   :  { %69 = vsyncpa [#allocation3], 1 }
  0xcd   :  { %70 = vsyncpa [#allocation5], 1 }

</bundles_post_ra>
